<compile_context>
chip_gen: v6e
topology: v6e:2x2x1
jax: 0.10.0
libtpu: 0.0.40
codegen_flags: <defaults>
</compile_context>

<pallas_src>
import jax
import jax.numpy as jnp
from jax.experimental import pallas as pl
from jax.experimental.pallas import tpu as pltpu


def _lstm_kernel(x_ref, h0_ref, c0_ref, wx_ref, wh_ref, bg_ref, hT_ref):
    """Whole recurrence in one invocation.

    x_ref : (S, B2, 1)   time-major inputs, rows = flattened (batch, track)
    h0/c0 : (B2, H)      initial state
    wx_ref: (1, 4H)      x-row of the 4 gate weights, gate-concatenated on lanes
    wh_ref: (H, 4H)      H-block of the 4 gate weights, gate-concatenated
    bg_ref: (1, 4H)      gate biases, gate-concatenated
    hT_ref: (B2, H)      final hidden state (projection done outside)
    """
    S = x_ref.shape[0]
    H = h0_ref.shape[-1]

    h = h0_ref[...]
    c = c0_ref[...]
    wx = wx_ref[...]
    wh = wh_ref[...]
    bg = bg_ref[...]

    # S is small and static -> fully unrolled; the only serial dependency is h/c.
    for t in range(S):
        x_t = x_ref[t]                                   # (B2, 1)
        # One fused lane-dense gate matmul per step: (B2,H) @ (H,4H).
        gates = (x_t * wx
                 + jnp.dot(h, wh, preferred_element_type=jnp.float32)
                 + bg)                                   # (B2, 4H)
        i_t = jax.nn.sigmoid(gates[:, 0 * H:1 * H])
        f_t = jax.nn.sigmoid(gates[:, 1 * H:2 * H])
        c_hat = jnp.tanh(gates[:, 2 * H:3 * H])
        o_t = gates[:, 3 * H:4 * H]                      # NOTE: no sigmoid (matches module)
        c = f_t * c + i_t * c_hat
        h = o_t * jnp.tanh(c)

    hT_ref[...] = h


@jax.jit
def bayesian_lstm_forward(x, h0, c0, wx_f, wh_f, bg_f, w_out, b_out):
    """x: [B, S, 2] f32.  Returns [B, 1, 2] (output_dim == 1)."""
    B, S, two = x.shape
    assert two == 2
    B2 = B * 2
    H = h0.shape[-1]
    OUT = w_out.shape[-1]

    # time-major, flattened (B, 2) rows: [S, B*2, 1]
    x_tm = jnp.transpose(x, (1, 0, 2)).reshape(S, B2, 1).astype(jnp.float32)
    h0f = h0.reshape(B2, H).astype(jnp.float32)
    c0f = c0.reshape(B2, H).astype(jnp.float32)

    in_specs = [pl.BlockSpec(memory_space=pltpu.MemorySpace.VMEM)
                for _ in range(6)]
    hT = pl.pallas_call(
        _lstm_kernel,
        out_shape=jax.ShapeDtypeStruct((B2, H), jnp.float32),
        in_specs=in_specs,
        out_specs=pl.BlockSpec(memory_space=pltpu.MemorySpace.VMEM),
    )(x_tm, h0f, c0f, wx_f, wh_f, bg_f)

    # Final H -> OUT projection is 32x1: do it in plain XLA (cheap, avoids a
    # degenerate N=1 MXU op and a masked single-lane store in the kernel).
    out = jnp.dot(hT, w_out) + b_out                     # (B2, OUT)
    # [B*2, 1] -> [B, 2, 1] -> squeeze(2) -> [B, 2] -> unsqueeze(1) -> [B, 1, 2]
    return out.reshape(B, 2, OUT).squeeze(2)[:, None, :]


def _reference_forward(x, h0, c0, wx, wh, bg, w_out, b_out):
    """Pure-JAX reference mirroring the PyTorch forward (eval, no sampling)."""
    B, S, _ = x.shape
    h = h0.astype(jnp.float32)
    c = c0.astype(jnp.float32)
    for t in range(S):
        x_t = x[:, t][..., None]                                  # [B, 2, 1]

        def gate(g):
            return (x_t * wx[g][None]
                    + jnp.einsum("bjh,hk->bjk", h, wh[g])
                    + bg[g][None])

        i_t = jax.nn.sigmoid(gate(0))
        f_t = jax.nn.sigmoid(gate(1))
        c_hat = jnp.tanh(gate(2))
        o_t = gate(3)                                             # no sigmoid
        c = f_t * c + i_t * c_hat
        h = o_t * jnp.tanh(c)
    out = jnp.einsum("bjh,hk->bjk", h, w_out) + b_out[None]       # [B, 2, 1]
    return out.squeeze(2)[:, None, :]                             # [B, 1, 2]


if __name__ == "__main__":
    # Small shapes consistent with the module: batch=2, seq=8, hidden=32,
    # input_dim=1 (implied by the concat), output_dim=1.
    B, S, HID, OUT = 2, 8, 32, 1
    IN_FEAT = 1 + HID

    key = jax.random.PRNGKey(0)
    ks = jax.random.split(key, 16)

    # Deterministic "weight_mu"/"bias_mu" parameters, uniform(-0.2, 0.2),
    # matching the shapes from BayesLSTM_Linear.__init__.
    gate_w = [jax.random.uniform(ks[i], (IN_FEAT, HID), jnp.float32,
                                 minval=-0.2, maxval=0.2) for i in range(4)]
    gate_b = [jax.random.uniform(ks[4 + i], (1, HID), jnp.float32,
                                 minval=-0.2, maxval=0.2) for i in range(4)]
    w_out = jax.random.uniform(ks[8], (HID, OUT), jnp.float32,
                               minval=-0.2, maxval=0.2)
    b_out = jax.random.uniform(ks[9], (1, OUT), jnp.float32,
                               minval=-0.2, maxval=0.2)

    # Fused weights for the kernel: gate order [input, forget, cell, output],
    # concatenated along the output/lane axis -> 4H = 128 lanes.
    wx_f = jnp.concatenate([w[0:1, :] for w in gate_w], axis=1)   # [1, 4H]
    wh_f = jnp.concatenate([w[1:, :] for w in gate_w], axis=1)    # [H, 4H]
    bg_f = jnp.concatenate(gate_b, axis=1)                        # [1, 4H]

    # Per-gate stacked weights for the pure-JAX reference.
    wx = jnp.stack([w[0:1, :] for w in gate_w], axis=0)           # [4, 1, H]
    wh = jnp.stack([w[1:, :] for w in gate_w], axis=0)            # [4, H, H]
    bg = jnp.stack(gate_b, axis=0)                                # [4, 1, H]

    # Input x: [B, S, 2]
    x = jax.random.normal(ks[10], (B, S, 2), jnp.float32)

    # H_prev / C_prev ~ kaiming_normal_ on a [B, 2, HID] tensor:
    # fan_in = 2 * HID, gain = sqrt(2)  =>  std = 1/sqrt(HID)
    std = 1.0 / jnp.sqrt(jnp.float32(HID))
    h0 = jax.random.normal(ks[11], (B, 2, HID), jnp.float32) * std
    c0 = jax.random.normal(ks[12], (B, 2, HID), jnp.float32) * std

    out = bayesian_lstm_forward(x, h0, c0, wx_f, wh_f, bg_f, w_out, b_out)
    out = jax.block_until_ready(out)

    ref = _reference_forward(x, h0, c0, wx, wh, bg, w_out, b_out)
    assert out.shape == (B, 1, 2), out.shape
    assert jnp.allclose(out, ref, rtol=1e-5, atol=1e-5), (out, ref)

    print("KERNEL_OK")
</pallas_src>

<mosaic_0001>
module attributes {stable_mosaic.version = 11 : i64} {
  func.func @_lstm_kernel(%arg0: memref<8x4x1xf32, #tpu.memory_space<vmem>>, %arg1: memref<4x32xf32, #tpu.memory_space<vmem>>, %arg2: memref<4x32xf32, #tpu.memory_space<vmem>>, %arg3: memref<1x128xf32, #tpu.memory_space<vmem>>, %arg4: memref<32x128xf32, #tpu.memory_space<vmem>>, %arg5: memref<1x128xf32, #tpu.memory_space<vmem>>, %arg6: memref<4x32xf32, #tpu.memory_space<vmem>>) attributes {dimension_semantics = [], scalar_prefetch = 0 : i64, scratch_operands = 0 : i64, tpu.core_type = #tpu.core_type<tc>} {
    %c0 = arith.constant 0 : index
    %c0_0 = arith.constant 0 : index
    %0 = vector.load %arg1[%c0, %c0_0] : memref<4x32xf32, #tpu.memory_space<vmem>>, vector<4x32xf32>
    %c0_1 = arith.constant 0 : index
    %c0_2 = arith.constant 0 : index
    %1 = vector.load %arg2[%c0_1, %c0_2] : memref<4x32xf32, #tpu.memory_space<vmem>>, vector<4x32xf32>
    %c0_3 = arith.constant 0 : index
    %c0_4 = arith.constant 0 : index
    %2 = vector.load %arg3[%c0_3, %c0_4] : memref<1x128xf32, #tpu.memory_space<vmem>>, vector<1x128xf32>
    %c0_5 = arith.constant 0 : index
    %c0_6 = arith.constant 0 : index
    %3 = vector.load %arg4[%c0_5, %c0_6] : memref<32x128xf32, #tpu.memory_space<vmem>>, vector<32x128xf32>
    %c0_7 = arith.constant 0 : index
    %c0_8 = arith.constant 0 : index
    %4 = vector.load %arg5[%c0_7, %c0_8] : memref<1x128xf32, #tpu.memory_space<vmem>>, vector<1x128xf32>
    %c0_9 = arith.constant 0 : index
    %c0_10 = arith.constant 0 : index
    %c0_11 = arith.constant 0 : index
    %5 = vector.load %arg0[%c0_9, %c0_10, %c0_11] : memref<8x4x1xf32, #tpu.memory_space<vmem>>, vector<1x4x1xf32>
    %6 = vector.shape_cast %5 : vector<1x4x1xf32> to vector<4x1xf32>
    %7 = vector.broadcast %6 : vector<4x1xf32> to vector<4x128xf32>
    %8 = vector.broadcast %2 : vector<1x128xf32> to vector<4x128xf32>
    %9 = arith.mulf %7, %8 : vector<4x128xf32>
    %cst = arith.constant dense<0.000000e+00> : vector<4x128xf32>
    %10 = tpu.matmul %0, %3, %cst {dimension_numbers = #tpu.dot_dimension_numbers<[1], [0], [0], [1], [0, 0, 1, 1], [], []>} : vector<4x32xf32>, vector<32x128xf32>, vector<4x128xf32> -> vector<4x128xf32>
    %11 = arith.addf %9, %10 : vector<4x128xf32>
    %12 = vector.broadcast %4 : vector<1x128xf32> to vector<4x128xf32>
    %13 = arith.addf %11, %12 : vector<4x128xf32>
    %14 = vector.extract_strided_slice %13 {offsets = [0, 0], sizes = [4, 32], strides = [1, 1]} : vector<4x128xf32> to vector<4x32xf32>
    %15 = arith.negf %14 : vector<4x32xf32>
    %16 = math.exp %15 : vector<4x32xf32>
    %cst_12 = arith.constant 1.000000e+00 : f32
    %17 = vector.broadcast %cst_12 : f32 to vector<4x32xf32>
    %18 = arith.addf %17, %16 : vector<4x32xf32>
    %19 = arith.divf %17, %18 : vector<4x32xf32>
    %20 = vector.extract_strided_slice %13 {offsets = [0, 32], sizes = [4, 32], strides = [1, 1]} : vector<4x128xf32> to vector<4x32xf32>
    %21 = arith.negf %20 : vector<4x32xf32>
    %22 = math.exp %21 : vector<4x32xf32>
    %cst_13 = arith.constant 1.000000e+00 : f32
    %23 = vector.broadcast %cst_13 : f32 to vector<4x32xf32>
    %24 = arith.addf %23, %22 : vector<4x32xf32>
    %25 = arith.divf %23, %24 : vector<4x32xf32>
    %26 = vector.extract_strided_slice %13 {offsets = [0, 64], sizes = [4, 32], strides = [1, 1]} : vector<4x128xf32> to vector<4x32xf32>
    %27 = math.tanh %26 : vector<4x32xf32>
    %28 = vector.extract_strided_slice %13 {offsets = [0, 96], sizes = [4, 32], strides = [1, 1]} : vector<4x128xf32> to vector<4x32xf32>
    %29 = arith.mulf %25, %1 : vector<4x32xf32>
    %30 = arith.mulf %19, %27 : vector<4x32xf32>
    %31 = arith.addf %29, %30 : vector<4x32xf32>
    %32 = math.tanh %31 : vector<4x32xf32>
    %33 = arith.mulf %28, %32 : vector<4x32xf32>
    %c1 = arith.constant 1 : index
    %c0_14 = arith.constant 0 : index
    %c0_15 = arith.constant 0 : index
    %34 = vector.load %arg0[%c1, %c0_14, %c0_15] : memref<8x4x1xf32, #tpu.memory_space<vmem>>, vector<1x4x1xf32>
    %35 = vector.shape_cast %34 : vector<1x4x1xf32> to vector<4x1xf32>
    %36 = vector.broadcast %35 : vector<4x1xf32> to vector<4x128xf32>
    %37 = vector.broadcast %2 : vector<1x128xf32> to vector<4x128xf32>
    %38 = arith.mulf %36, %37 : vector<4x128xf32>
    %cst_16 = arith.constant dense<0.000000e+00> : vector<4x128xf32>
    %39 = tpu.matmul %33, %3, %cst_16 {dimension_numbers = #tpu.dot_dimension_numbers<[1], [0], [0], [1], [0, 0, 1, 1], [], []>} : vector<4x32xf32>, vector<32x128xf32>, vector<4x128xf32> -> vector<4x128xf32>
    %40 = arith.addf %38, %39 : vector<4x128xf32>
    %41 = vector.broadcast %4 : vector<1x128xf32> to vector<4x128xf32>
    %42 = arith.addf %40, %41 : vector<4x128xf32>
    %43 = vector.extract_strided_slice %42 {offsets = [0, 0], sizes = [4, 32], strides = [1, 1]} : vector<4x128xf32> to vector<4x32xf32>
    %44 = arith.negf %43 : vector<4x32xf32>
    %45 = math.exp %44 : vector<4x32xf32>
    %cst_17 = arith.constant 1.000000e+00 : f32
    %46 = vector.broadcast %cst_17 : f32 to vector<4x32xf32>
    %47 = arith.addf %46, %45 : vector<4x32xf32>
    %48 = arith.divf %46, %47 : vector<4x32xf32>
    %49 = vector.extract_strided_slice %42 {offsets = [0, 32], sizes = [4, 32], strides = [1, 1]} : vector<4x128xf32> to vector<4x32xf32>
    %50 = arith.negf %49 : vector<4x32xf32>
    %51 = math.exp %50 : vector<4x32xf32>
    %cst_18 = arith.constant 1.000000e+00 : f32
    %52 = vector.broadcast %cst_18 : f32 to vector<4x32xf32>
    %53 = arith.addf %52, %51 : vector<4x32xf32>
    %54 = arith.divf %52, %53 : vector<4x32xf32>
    %55 = vector.extract_strided_slice %42 {offsets = [0, 64], sizes = [4, 32], strides = [1, 1]} : vector<4x128xf32> to vector<4x32xf32>
    %56 = math.tanh %55 : vector<4x32xf32>
    %57 = vector.extract_strided_slice %42 {offsets = [0, 96], sizes = [4, 32], strides = [1, 1]} : vector<4x128xf32> to vector<4x32xf32>
    %58 = arith.mulf %54, %31 : vector<4x32xf32>
    %59 = arith.mulf %48, %56 : vector<4x32xf32>
    %60 = arith.addf %58, %59 : vector<4x32xf32>
    %61 = math.tanh %60 : vector<4x32xf32>
    %62 = arith.mulf %57, %61 : vector<4x32xf32>
    %c2 = arith.constant 2 : index
    %c0_19 = arith.constant 0 : index
    %c0_20 = arith.constant 0 : index
    %63 = vector.load %arg0[%c2, %c0_19, %c0_20] : memref<8x4x1xf32, #tpu.memory_space<vmem>>, vector<1x4x1xf32>
    %64 = vector.shape_cast %63 : vector<1x4x1xf32> to vector<4x1xf32>
    %65 = vector.broadcast %64 : vector<4x1xf32> to vector<4x128xf32>
    %66 = vector.broadcast %2 : vector<1x128xf32> to vector<4x128xf32>
    %67 = arith.mulf %65, %66 : vector<4x128xf32>
    %cst_21 = arith.constant dense<0.000000e+00> : vector<4x128xf32>
    %68 = tpu.matmul %62, %3, %cst_21 {dimension_numbers = #tpu.dot_dimension_numbers<[1], [0], [0], [1], [0, 0, 1, 1], [], []>} : vector<4x32xf32>, vector<32x128xf32>, vector<4x128xf32> -> vector<4x128xf32>
    %69 = arith.addf %67, %68 : vector<4x128xf32>
    %70 = vector.broadcast %4 : vector<1x128xf32> to vector<4x128xf32>
    %71 = arith.addf %69, %70 : vector<4x128xf32>
    %72 = vector.extract_strided_slice %71 {offsets = [0, 0], sizes = [4, 32], strides = [1, 1]} : vector<4x128xf32> to vector<4x32xf32>
    %73 = arith.negf %72 : vector<4x32xf32>
    %74 = math.exp %73 : vector<4x32xf32>
    %cst_22 = arith.constant 1.000000e+00 : f32
    %75 = vector.broadcast %cst_22 : f32 to vector<4x32xf32>
    %76 = arith.addf %75, %74 : vector<4x32xf32>
    %77 = arith.divf %75, %76 : vector<4x32xf32>
    %78 = vector.extract_strided_slice %71 {offsets = [0, 32], sizes = [4, 32], strides = [1, 1]} : vector<4x128xf32> to vector<4x32xf32>
    %79 = arith.negf %78 : vector<4x32xf32>
    %80 = math.exp %79 : vector<4x32xf32>
    %cst_23 = arith.constant 1.000000e+00 : f32
    %81 = vector.broadcast %cst_23 : f32 to vector<4x32xf32>
    %82 = arith.addf %81, %80 : vector<4x32xf32>
    %83 = arith.divf %81, %82 : vector<4x32xf32>
    %84 = vector.extract_strided_slice %71 {offsets = [0, 64], sizes = [4, 32], strides = [1, 1]} : vector<4x128xf32> to vector<4x32xf32>
    %85 = math.tanh %84 : vector<4x32xf32>
    %86 = vector.extract_strided_slice %71 {offsets = [0, 96], sizes = [4, 32], strides = [1, 1]} : vector<4x128xf32> to vector<4x32xf32>
    %87 = arith.mulf %83, %60 : vector<4x32xf32>
    %88 = arith.mulf %77, %85 : vector<4x32xf32>
    %89 = arith.addf %87, %88 : vector<4x32xf32>
    %90 = math.tanh %89 : vector<4x32xf32>
    %91 = arith.mulf %86, %90 : vector<4x32xf32>
    %c3 = arith.constant 3 : index
    %c0_24 = arith.constant 0 : index
    %c0_25 = arith.constant 0 : index
    %92 = vector.load %arg0[%c3, %c0_24, %c0_25] : memref<8x4x1xf32, #tpu.memory_space<vmem>>, vector<1x4x1xf32>
    %93 = vector.shape_cast %92 : vector<1x4x1xf32> to vector<4x1xf32>
    %94 = vector.broadcast %93 : vector<4x1xf32> to vector<4x128xf32>
    %95 = vector.broadcast %2 : vector<1x128xf32> to vector<4x128xf32>
    %96 = arith.mulf %94, %95 : vector<4x128xf32>
    %cst_26 = arith.constant dense<0.000000e+00> : vector<4x128xf32>
    %97 = tpu.matmul %91, %3, %cst_26 {dimension_numbers = #tpu.dot_dimension_numbers<[1], [0], [0], [1], [0, 0, 1, 1], [], []>} : vector<4x32xf32>, vector<32x128xf32>, vector<4x128xf32> -> vector<4x128xf32>
    %98 = arith.addf %96, %97 : vector<4x128xf32>
    %99 = vector.broadcast %4 : vector<1x128xf32> to vector<4x128xf32>
    %100 = arith.addf %98, %99 : vector<4x128xf32>
    %101 = vector.extract_strided_slice %100 {offsets = [0, 0], sizes = [4, 32], strides = [1, 1]} : vector<4x128xf32> to vector<4x32xf32>
    %102 = arith.negf %101 : vector<4x32xf32>
    %103 = math.exp %102 : vector<4x32xf32>
    %cst_27 = arith.constant 1.000000e+00 : f32
    %104 = vector.broadcast %cst_27 : f32 to vector<4x32xf32>
    %105 = arith.addf %104, %103 : vector<4x32xf32>
    %106 = arith.divf %104, %105 : vector<4x32xf32>
    %107 = vector.extract_strided_slice %100 {offsets = [0, 32], sizes = [4, 32], strides = [1, 1]} : vector<4x128xf32> to vector<4x32xf32>
    %108 = arith.negf %107 : vector<4x32xf32>
    %109 = math.exp %108 : vector<4x32xf32>
    %cst_28 = arith.constant 1.000000e+00 : f32
    %110 = vector.broadcast %cst_28 : f32 to vector<4x32xf32>
    %111 = arith.addf %110, %109 : vector<4x32xf32>
    %112 = arith.divf %110, %111 : vector<4x32xf32>
    %113 = vector.extract_strided_slice %100 {offsets = [0, 64], sizes = [4, 32], strides = [1, 1]} : vector<4x128xf32> to vector<4x32xf32>
    %114 = math.tanh %113 : vector<4x32xf32>
    %115 = vector.extract_strided_slice %100 {offsets = [0, 96], sizes = [4, 32], strides = [1, 1]} : vector<4x128xf32> to vector<4x32xf32>
    %116 = arith.mulf %112, %89 : vector<4x32xf32>
    %117 = arith.mulf %106, %114 : vector<4x32xf32>
    %118 = arith.addf %116, %117 : vector<4x32xf32>
    %119 = math.tanh %118 : vector<4x32xf32>
    %120 = arith.mulf %115, %119 : vector<4x32xf32>
    %c4 = arith.constant 4 : index
    %c0_29 = arith.constant 0 : index
    %c0_30 = arith.constant 0 : index
    %121 = vector.load %arg0[%c4, %c0_29, %c0_30] : memref<8x4x1xf32, #tpu.memory_space<vmem>>, vector<1x4x1xf32>
    %122 = vector.shape_cast %121 : vector<1x4x1xf32> to vector<4x1xf32>
    %123 = vector.broadcast %122 : vector<4x1xf32> to vector<4x128xf32>
    %124 = vector.broadcast %2 : vector<1x128xf32> to vector<4x128xf32>
    %125 = arith.mulf %123, %124 : vector<4x128xf32>
    %cst_31 = arith.constant dense<0.000000e+00> : vector<4x128xf32>
    %126 = tpu.matmul %120, %3, %cst_31 {dimension_numbers = #tpu.dot_dimension_numbers<[1], [0], [0], [1], [0, 0, 1, 1], [], []>} : vector<4x32xf32>, vector<32x128xf32>, vector<4x128xf32> -> vector<4x128xf32>
    %127 = arith.addf %125, %126 : vector<4x128xf32>
    %128 = vector.broadcast %4 : vector<1x128xf32> to vector<4x128xf32>
    %129 = arith.addf %127, %128 : vector<4x128xf32>
    %130 = vector.extract_strided_slice %129 {offsets = [0, 0], sizes = [4, 32], strides = [1, 1]} : vector<4x128xf32> to vector<4x32xf32>
    %131 = arith.negf %130 : vector<4x32xf32>
    %132 = math.exp %131 : vector<4x32xf32>
    %cst_32 = arith.constant 1.000000e+00 : f32
    %133 = vector.broadcast %cst_32 : f32 to vector<4x32xf32>
    %134 = arith.addf %133, %132 : vector<4x32xf32>
    %135 = arith.divf %133, %134 : vector<4x32xf32>
    %136 = vector.extract_strided_slice %129 {offsets = [0, 32], sizes = [4, 32], strides = [1, 1]} : vector<4x128xf32> to vector<4x32xf32>
    %137 = arith.negf %136 : vector<4x32xf32>
    %138 = math.exp %137 : vector<4x32xf32>
    %cst_33 = arith.constant 1.000000e+00 : f32
    %139 = vector.broadcast %cst_33 : f32 to vector<4x32xf32>
    %140 = arith.addf %139, %138 : vector<4x32xf32>
    %141 = arith.divf %139, %140 : vector<4x32xf32>
    %142 = vector.extract_strided_slice %129 {offsets = [0, 64], sizes = [4, 32], strides = [1, 1]} : vector<4x128xf32> to vector<4x32xf32>
    %143 = math.tanh %142 : vector<4x32xf32>
    %144 = vector.extract_strided_slice %129 {offsets = [0, 96], sizes = [4, 32], strides = [1, 1]} : vector<4x128xf32> to vector<4x32xf32>
    %145 = arith.mulf %141, %118 : vector<4x32xf32>
    %146 = arith.mulf %135, %143 : vector<4x32xf32>
    %147 = arith.addf %145, %146 : vector<4x32xf32>
    %148 = math.tanh %147 : vector<4x32xf32>
    %149 = arith.mulf %144, %148 : vector<4x32xf32>
    %c5 = arith.constant 5 : index
    %c0_34 = arith.constant 0 : index
    %c0_35 = arith.constant 0 : index
    %150 = vector.load %arg0[%c5, %c0_34, %c0_35] : memref<8x4x1xf32, #tpu.memory_space<vmem>>, vector<1x4x1xf32>
    %151 = vector.shape_cast %150 : vector<1x4x1xf32> to vector<4x1xf32>
    %152 = vector.broadcast %151 : vector<4x1xf32> to vector<4x128xf32>
    %153 = vector.broadcast %2 : vector<1x128xf32> to vector<4x128xf32>
    %154 = arith.mulf %152, %153 : vector<4x128xf32>
    %cst_36 = arith.constant dense<0.000000e+00> : vector<4x128xf32>
    %155 = tpu.matmul %149, %3, %cst_36 {dimension_numbers = #tpu.dot_dimension_numbers<[1], [0], [0], [1], [0, 0, 1, 1], [], []>} : vector<4x32xf32>, vector<32x128xf32>, vector<4x128xf32> -> vector<4x128xf32>
    %156 = arith.addf %154, %155 : vector<4x128xf32>
    %157 = vector.broadcast %4 : vector<1x128xf32> to vector<4x128xf32>
    %158 = arith.addf %156, %157 : vector<4x128xf32>
    %159 = vector.extract_strided_slice %158 {offsets = [0, 0], sizes = [4, 32], strides = [1, 1]} : vector<4x128xf32> to vector<4x32xf32>
    %160 = arith.negf %159 : vector<4x32xf32>
    %161 = math.exp %160 : vector<4x32xf32>
    %cst_37 = arith.constant 1.000000e+00 : f32
    %162 = vector.broadcast %cst_37 : f32 to vector<4x32xf32>
    %163 = arith.addf %162, %161 : vector<4x32xf32>
    %164 = arith.divf %162, %163 : vector<4x32xf32>
    %165 = vector.extract_strided_slice %158 {offsets = [0, 32], sizes = [4, 32], strides = [1, 1]} : vector<4x128xf32> to vector<4x32xf32>
    %166 = arith.negf %165 : vector<4x32xf32>
    %167 = math.exp %166 : vector<4x32xf32>
    %cst_38 = arith.constant 1.000000e+00 : f32
    %168 = vector.broadcast %cst_38 : f32 to vector<4x32xf32>
    %169 = arith.addf %168, %167 : vector<4x32xf32>
    %170 = arith.divf %168, %169 : vector<4x32xf32>
    %171 = vector.extract_strided_slice %158 {offsets = [0, 64], sizes = [4, 32], strides = [1, 1]} : vector<4x128xf32> to vector<4x32xf32>
    %172 = math.tanh %171 : vector<4x32xf32>
    %173 = vector.extract_strided_slice %158 {offsets = [0, 96], sizes = [4, 32], strides = [1, 1]} : vector<4x128xf32> to vector<4x32xf32>
    %174 = arith.mulf %170, %147 : vector<4x32xf32>
    %175 = arith.mulf %164, %172 : vector<4x32xf32>
    %176 = arith.addf %174, %175 : vector<4x32xf32>
    %177 = math.tanh %176 : vector<4x32xf32>
    %178 = arith.mulf %173, %177 : vector<4x32xf32>
    %c6 = arith.constant 6 : index
    %c0_39 = arith.constant 0 : index
    %c0_40 = arith.constant 0 : index
    %179 = vector.load %arg0[%c6, %c0_39, %c0_40] : memref<8x4x1xf32, #tpu.memory_space<vmem>>, vector<1x4x1xf32>
    %180 = vector.shape_cast %179 : vector<1x4x1xf32> to vector<4x1xf32>
    %181 = vector.broadcast %180 : vector<4x1xf32> to vector<4x128xf32>
    %182 = vector.broadcast %2 : vector<1x128xf32> to vector<4x128xf32>
    %183 = arith.mulf %181, %182 : vector<4x128xf32>
    %cst_41 = arith.constant dense<0.000000e+00> : vector<4x128xf32>
    %184 = tpu.matmul %178, %3, %cst_41 {dimension_numbers = #tpu.dot_dimension_numbers<[1], [0], [0], [1], [0, 0, 1, 1], [], []>} : vector<4x32xf32>, vector<32x128xf32>, vector<4x128xf32> -> vector<4x128xf32>
    %185 = arith.addf %183, %184 : vector<4x128xf32>
    %186 = vector.broadcast %4 : vector<1x128xf32> to vector<4x128xf32>
    %187 = arith.addf %185, %186 : vector<4x128xf32>
    %188 = vector.extract_strided_slice %187 {offsets = [0, 0], sizes = [4, 32], strides = [1, 1]} : vector<4x128xf32> to vector<4x32xf32>
    %189 = arith.negf %188 : vector<4x32xf32>
    %190 = math.exp %189 : vector<4x32xf32>
    %cst_42 = arith.constant 1.000000e+00 : f32
    %191 = vector.broadcast %cst_42 : f32 to vector<4x32xf32>
    %192 = arith.addf %191, %190 : vector<4x32xf32>
    %193 = arith.divf %191, %192 : vector<4x32xf32>
    %194 = vector.extract_strided_slice %187 {offsets = [0, 32], sizes = [4, 32], strides = [1, 1]} : vector<4x128xf32> to vector<4x32xf32>
    %195 = arith.negf %194 : vector<4x32xf32>
    %196 = math.exp %195 : vector<4x32xf32>
    %cst_43 = arith.constant 1.000000e+00 : f32
    %197 = vector.broadcast %cst_43 : f32 to vector<4x32xf32>
    %198 = arith.addf %197, %196 : vector<4x32xf32>
    %199 = arith.divf %197, %198 : vector<4x32xf32>
    %200 = vector.extract_strided_slice %187 {offsets = [0, 64], sizes = [4, 32], strides = [1, 1]} : vector<4x128xf32> to vector<4x32xf32>
    %201 = math.tanh %200 : vector<4x32xf32>
    %202 = vector.extract_strided_slice %187 {offsets = [0, 96], sizes = [4, 32], strides = [1, 1]} : vector<4x128xf32> to vector<4x32xf32>
    %203 = arith.mulf %199, %176 : vector<4x32xf32>
    %204 = arith.mulf %193, %201 : vector<4x32xf32>
    %205 = arith.addf %203, %204 : vector<4x32xf32>
    %206 = math.tanh %205 : vector<4x32xf32>
    %207 = arith.mulf %202, %206 : vector<4x32xf32>
    %c7 = arith.constant 7 : index
    %c0_44 = arith.constant 0 : index
    %c0_45 = arith.constant 0 : index
    %208 = vector.load %arg0[%c7, %c0_44, %c0_45] : memref<8x4x1xf32, #tpu.memory_space<vmem>>, vector<1x4x1xf32>
    %209 = vector.shape_cast %208 : vector<1x4x1xf32> to vector<4x1xf32>
    %210 = vector.broadcast %209 : vector<4x1xf32> to vector<4x128xf32>
    %211 = vector.broadcast %2 : vector<1x128xf32> to vector<4x128xf32>
    %212 = arith.mulf %210, %211 : vector<4x128xf32>
    %cst_46 = arith.constant dense<0.000000e+00> : vector<4x128xf32>
    %213 = tpu.matmul %207, %3, %cst_46 {dimension_numbers = #tpu.dot_dimension_numbers<[1], [0], [0], [1], [0, 0, 1, 1], [], []>} : vector<4x32xf32>, vector<32x128xf32>, vector<4x128xf32> -> vector<4x128xf32>
    %214 = arith.addf %212, %213 : vector<4x128xf32>
    %215 = vector.broadcast %4 : vector<1x128xf32> to vector<4x128xf32>
    %216 = arith.addf %214, %215 : vector<4x128xf32>
    %217 = vector.extract_strided_slice %216 {offsets = [0, 0], sizes = [4, 32], strides = [1, 1]} : vector<4x128xf32> to vector<4x32xf32>
    %218 = arith.negf %217 : vector<4x32xf32>
    %219 = math.exp %218 : vector<4x32xf32>
    %cst_47 = arith.constant 1.000000e+00 : f32
    %220 = vector.broadcast %cst_47 : f32 to vector<4x32xf32>
    %221 = arith.addf %220, %219 : vector<4x32xf32>
    %222 = arith.divf %220, %221 : vector<4x32xf32>
    %223 = vector.extract_strided_slice %216 {offsets = [0, 32], sizes = [4, 32], strides = [1, 1]} : vector<4x128xf32> to vector<4x32xf32>
    %224 = arith.negf %223 : vector<4x32xf32>
    %225 = math.exp %224 : vector<4x32xf32>
    %cst_48 = arith.constant 1.000000e+00 : f32
    %226 = vector.broadcast %cst_48 : f32 to vector<4x32xf32>
    %227 = arith.addf %226, %225 : vector<4x32xf32>
    %228 = arith.divf %226, %227 : vector<4x32xf32>
    %229 = vector.extract_strided_slice %216 {offsets = [0, 64], sizes = [4, 32], strides = [1, 1]} : vector<4x128xf32> to vector<4x32xf32>
    %230 = math.tanh %229 : vector<4x32xf32>
    %231 = vector.extract_strided_slice %216 {offsets = [0, 96], sizes = [4, 32], strides = [1, 1]} : vector<4x128xf32> to vector<4x32xf32>
    %232 = arith.mulf %228, %205 : vector<4x32xf32>
    %233 = arith.mulf %222, %230 : vector<4x32xf32>
    %234 = arith.addf %232, %233 : vector<4x32xf32>
    %235 = math.tanh %234 : vector<4x32xf32>
    %236 = arith.mulf %231, %235 : vector<4x32xf32>
    %c0_49 = arith.constant 0 : index
    %c0_50 = arith.constant 0 : index
    %237 = vector.load %arg6[%c0_49, %c0_50] : memref<4x32xf32, #tpu.memory_space<vmem>>, vector<4x32xf32>
    tpu.vector_store %arg6[%c0_49, %c0_50], %236 {strides = array<i32>} : memref<4x32xf32, #tpu.memory_space<vmem>>, vector<4x32xf32>,
    return
  }
}

</mosaic_0001>

<bundles_post_ra>
// kernel: bayesian_lstm_forward.1
= control target key start
LH: loop header
LB: loop body
LE: loop exit
PB: predicated region body
PF: predicated region fallthrough
CT: control target
= control target key end

     0   :  { %v1151_v0 = vmov 0.0   ;;  %vm1152_vm0 = vmmov 0   ;;  %v1153_v3 = vmov 0   ;;  %s1154_s7 = smov 32   ;;  %vm44_vm1 = vcmask 261120   ;;  %s1155_s13 = smov 64   ;;  %s1391_s4 = inlined_call_operand.vmem [shape: f32[32,128], index: 4, kind: input, shape index: {}]   ;;  %s1392_s0 = inlined_call_operand.vmem [shape: f32[8,4,1], index: 0, kind: input, shape index: {}]   ;;  %s1393_s2 = inlined_call_operand.vmem [shape: f32[4,32], index: 2, kind: input, shape index: {}]   ;;  %s1394_s1 = inlined_call_operand.vmem [shape: f32[4,32], index: 1, kind: input, shape index: {}]   ;;  %s1395_s3 = inlined_call_operand.vmem [shape: f32[1,128], index: 3, kind: input, shape index: {}]   ;;  %s1396_s5 = inlined_call_operand.vmem [shape: f32[1,128], index: 5, kind: input, shape index: {}]   ;;  %s1397_s6 = inlined_call_operand.vmem [shape: f32[4,32], index: 6, kind: output, shape index: {}]  }
   0x1   :  { %992 = vmatprep.subr.mxu0 %v1151_v0  ;;  %v1195_v1 = vld [vmem:[%s1391_s4 + $0x18] sm:$0xff]  ;;  %v1200_v2 = vld [vmem:[%s1391_s4 + $0x10] sm:$0xff]  ;;  %1000 = vmatprep.mubr.msk.f32.mxu0 %vm1152_vm0, %v1151_v0  ;;  %v31_v4 = vld [vmem:[%s1392_s0] sm:$0xf]  ;;  %vm921_vm2 = vcmask 257024  }
   0x2   :  { %993 = vmatpush3.msra.mxu0 %v1195_v1  ;;  %1085 = vset.pattern.permute.xlu0 %v1153_v3  ;;  %v1212_v5 = vld [vmem:[%s1391_s4 + $0x8] sm:$0xff]  ;;  %v24_v6 = vld [vmem:[%s1393_s2] sm:$0xf]  ;;  %v931_v29 = vld [vmem:[%s1392_s0 + $0x4] sm:$0xf] }
   0x3   :  { %994 = vmatprep.subr.mxu0 %v1151_v0  ;;  %34 = vperm.xlu0 %1085, %v31_v4   ;;  %v1223_v7 = vld [vmem:[%s1391_s4] sm:$0xff]  ;;  %v934_v50 = vld [vmem:[%s1392_s0 + $0x8] sm:$0xf] }
   0x4   :  { %995 = vmatpush3.msra.mxu0 %v1200_v2  ;;  %134 = vrot.lane.b32.xlu1 %v24_v6, %s1154_s7  ;;  %v23_v8 = vld [vmem:[%s1394_s1] sm:$0xf] }
   0x5   :  { %996 = vmatprep.subr.mxu0 %v1151_v0  ;;  %1003 = vmatprep.subr.mxu1 %v1151_v0  ;;  %v1257_v9 = vld [vmem:[%s1395_s3] ss:$0 sm:$0xff] }
   0x6   :  { %997 = vmatpush3.msra.mxu0 %v1212_v5  ;;  %1004 = vmatpush3.msra.mxu1 %v1195_v1  ;;  %v1263_v12 = vld [vmem:[%s1396_s5] ss:$0 sm:$0xff] }
   0x7   :  { %998 = vmatprep.subr.mxu0 %v1151_v0  ;;  %1005 = vmatprep.subr.mxu1 %v1151_v0 }
   0x8   :  { %999 = vmatpush3.msra.mxu0 %v1223_v7  ;;  %1006 = vmatpush3.msra.mxu1 %v1200_v2 }
   0x9   :  { %1001 = vmatmul.mubr.msk.f32.vlgmr.msra.gmra.mxu0 %vm44_vm1, %v23_v8  ;;  %1007 = vmatprep.subr.mxu1 %v1151_v0 }
   0xa   :  { %1008 = vmatpush3.msra.mxu1 %v1212_v5  ;;  %1011 = vmatprep.mubr.msk.f32.mxu1 %vm1152_vm0, %v1151_v0 }
   0xb   :  { %1009 = vmatprep.subr.mxu1 %v1151_v0  ;;  %1014 = vmatprep.subr.mxu0 %v1151_v0 }
   0xc   :  { %1010 = vmatpush3.msra.mxu1 %v1223_v7  ;;  %1015 = vmatpush3.msra.mxu0 %v1195_v1 }
   0xd   :  { %1016 = vmatprep.subr.mxu0 %v1151_v0  ;;  %1022 = vmatprep.mubr.msk.f32.mxu0 %vm1152_vm0, %v1151_v0 }
   0xe   :  { %1017 = vmatpush3.msra.mxu0 %v1200_v2  ;;  %1086 = vset.pattern.permute.xlu1 %v1153_v3 }
   0xf   :  { %1018 = vmatprep.subr.mxu0 %v1151_v0  ;;  %1025 = vmatprep.subr.mxu1 %v1151_v0 }
  0x10   :  { %1019 = vmatpush3.msra.mxu0 %v1212_v5 }
  0x11   :  { %1020 = vmatprep.subr.mxu0 %v1151_v0 }
  0x12   :  { %1021 = vmatpush3.msra.mxu0 %v1223_v7 }
  0x13   :  { %1036 = vmatprep.subr.mxu0 %v1151_v0 }
  0x76   :  { %v135_v24 = vpop.permute.xlu1 %134 }
  0x7e   :  { %v35_v10 = vpop.permute.xlu0 %34 }
  0x7f   :  { %v43_v11 = vmul.f32 %v1257_v9, %v35_v10 }
  0xc9   :  { %v114_v13 = vpop.f32.mrf.mxu0 }
  0xca   :  { %v118_v14 = vadd.f32 %v114_v13, %v43_v11 }
  0xcb   :  { %v1002_v15 = vpop.f32.mrf.mxu0 }
  0xcc   :  { %v125_v16 = vadd.f32 %v1263_v12, %v118_v14  ;;  %v937_v14 = vld [vmem:[%s1392_s0 + $0xc] sm:$0xf] }
  0xce   :  { %1087 = vtanh.f32 %v125_v16  ;;  %v930_v18 = vmul.f32 -1.442695, %v125_v16 }
  0xd0   :  { %1089 = vpow2.f32 %v930_v18 }
  0xdb   :  { %v1088_v17 = vpop.eup %1087 }
  0xdc   :  { %139 = vrot.lane.b32.xlu0 %v1088_v17, %s1155_s13 }
  0xdd   :  { %v1090_v19 = vpop.eup %1089 }
  0xde   :  { %v129_v20 = vadd.f32 1.0, %v1090_v19 }
  0xe0   :  { %1091 = vrcp.f32 %v129_v20 }
  0xed   :  { %v1092_v21 = vpop.eup %1091 }
  0xee   :  { %v137_v25 = vmul.f32 %v1092_v21, %v135_v24 }
 0x14e   :  { %v140_v22 = vpop.permute.xlu0 %139 }
 0x14f   :  { %v142_v23 = vmul.f32 %v1092_v21, %v140_v22 }
 0x151   :  { %144 = vrot.lane.b32.xlu1 %v142_v23, %s1154_s7 }
 0x1c3   :  { %v145_v26 = vpop.permute.xlu1 %144 }
 0x1c4   :  { %v147_v27 = vadd.f32 %v145_v26, %v137_v25 }
 0x1c6   :  { %1093 = vtanh.f32 %v147_v27 }
 0x1d3   :  { %v1094_v28 = vpop.eup %1093 }
 0x1d4   :  { %150 = vrot.lane.b32.xlu0 %v1094_v28, %s1155_s13 }
 0x1d8   :  { %158 = vperm.xlu0 %1085, %v931_v29  }
 0x246   :  { %v151_v30 = vpop.permute.xlu0 %150 }
 0x247   :  { %v153_v31 = vmul.f32 %v151_v30, %v125_v16 }
 0x249   :  { %163 = vrot.lane.b32.xlu1 %v153_v31, %s1154_s7 }
 0x253   :  { %v159_v33 = vpop.permute.xlu0 %158 }
 0x254   :  { %v161_v34 = vmul.f32 %v1257_v9, %v159_v33 }
 0x2bb   :  { %v164_v32 = vpop.permute.xlu1 %163 }
 0x2bc   :  { %1012 = vmatmul.mubr.msk.f32.vlgmr.msra.gmra.mxu1 %vm44_vm1, %v164_v32 }
 0x2bd   :  { %1026 = vmatpush3.msra.mxu1 %v1195_v1  ;;  %1033 = vmatprep.mubr.msk.f32.mxu1 %vm1152_vm0, %v1151_v0 }
 0x2be   :  { %1027 = vmatprep.subr.mxu1 %v1151_v0 }
 0x2bf   :  { %1028 = vmatpush3.msra.mxu1 %v1200_v2 }
 0x2c0   :  { %1029 = vmatprep.subr.mxu1 %v1151_v0 }
 0x2c1   :  { %1030 = vmatpush3.msra.mxu1 %v1212_v5 }
 0x2c2   :  { %1031 = vmatprep.subr.mxu1 %v1151_v0 }
 0x2c3   :  { %1032 = vmatpush3.msra.mxu1 %v1223_v7 }
 0x2c4   :  { %1047 = vmatprep.subr.mxu1 %v1151_v0 }
 0x37c   :  { %v233_v35 = vpop.f32.mrf.mxu1 }
 0x37d   :  { %v237_v36 = vadd.f32 %v233_v35, %v161_v34  ;;  %v940_v35 = vld [vmem:[%s1392_s0 + $0x10] sm:$0xf] }
 0x37e   :  { %v1013_v37 = vpop.f32.mrf.mxu1 }
 0x37f   :  { %v238_v38 = vadd.f32 %v1263_v12, %v237_v36 }
 0x381   :  { %1095 = vtanh.f32 %v238_v38  ;;  %v933_v40 = vmul.f32 -1.442695, %v238_v38 }
 0x383   :  { %1097 = vpow2.f32 %v933_v40 }
 0x38e   :  { %v1096_v39 = vpop.eup %1095 }
 0x38f   :  { %248 = vrot.lane.b32.xlu1 %v1096_v39, %s1155_s13 }
 0x390   :  { %v1098_v41 = vpop.eup %1097 }
 0x391   :  { %v242_v42 = vadd.f32 1.0, %v1098_v41 }
 0x393   :  { %1099 = vrcp.f32 %v242_v42 }
 0x3a0   :  { %v1100_v43 = vpop.eup %1099 }
 0x3a1   :  { %v246_v46 = vmul.f32 %v1100_v43, %v147_v27 }
 0x401   :  { %v249_v44 = vpop.permute.xlu1 %248 }
 0x402   :  { %v251_v45 = vmul.f32 %v1100_v43, %v249_v44 }
 0x404   :  { %253 = vrot.lane.b32.xlu0 %v251_v45, %s1154_s7 }
 0x476   :  { %v254_v47 = vpop.permute.xlu0 %253 }
 0x477   :  { %v256_v48 = vadd.f32 %v254_v47, %v246_v46 }
 0x479   :  { %1101 = vtanh.f32 %v256_v48 }
 0x486   :  { %v1102_v49 = vpop.eup %1101 }
 0x487   :  { %259 = vrot.lane.b32.xlu1 %v1102_v49, %s1155_s13 }
 0x48b   :  { %267 = vperm.xlu1 %1086, %v934_v50  }
 0x4f9   :  { %v260_v51 = vpop.permute.xlu1 %259 }
 0x4fa   :  { %v262_v52 = vmul.f32 %v260_v51, %v238_v38 }
 0x4fc   :  { %272 = vrot.lane.b32.xlu0 %v262_v52, %s1154_s7 }
 0x506   :  { %v268_v54 = vpop.permute.xlu1 %267 }
 0x507   :  { %v270_v55 = vmul.f32 %v1257_v9, %v268_v54 }
 0x56e   :  { %v273_v53 = vpop.permute.xlu0 %272 }
 0x56f   :  { %1023 = vmatmul.mubr.msk.f32.vlgmr.msra.gmra.mxu0 %vm44_vm1, %v273_v53 }
 0x570   :  { %1037 = vmatpush3.msra.mxu0 %v1195_v1  ;;  %1044 = vmatprep.mubr.msk.f32.mxu0 %vm1152_vm0, %v1151_v0 }
 0x571   :  { %1038 = vmatprep.subr.mxu0 %v1151_v0 }
 0x572   :  { %1039 = vmatpush3.msra.mxu0 %v1200_v2 }
 0x573   :  { %1040 = vmatprep.subr.mxu0 %v1151_v0 }
 0x574   :  { %1041 = vmatpush3.msra.mxu0 %v1212_v5 }
 0x575   :  { %1042 = vmatprep.subr.mxu0 %v1151_v0 }
 0x576   :  { %1043 = vmatpush3.msra.mxu0 %v1223_v7 }
 0x577   :  { %1058 = vmatprep.subr.mxu0 %v1151_v0 }
 0x62f   :  { %v342_v56 = vpop.f32.mrf.mxu0 }
 0x630   :  { %v346_v57 = vadd.f32 %v342_v56, %v270_v55  ;;  %v943_v56 = vld [vmem:[%s1392_s0 + $0x14] sm:$0xf] }
 0x631   :  { %v1024_v58 = vpop.f32.mrf.mxu0 }
 0x632   :  { %v347_v59 = vadd.f32 %v1263_v12, %v346_v57 }
 0x634   :  { %1103 = vtanh.f32 %v347_v59  ;;  %v936_v61 = vmul.f32 -1.442695, %v347_v59 }
 0x636   :  { %1105 = vpow2.f32 %v936_v61 }
 0x641   :  { %v1104_v60 = vpop.eup %1103 }
 0x642   :  { %357 = vrot.lane.b32.xlu0 %v1104_v60, %s1155_s13 }
 0x643   :  { %v1106_v62 = vpop.eup %1105 }
 0x644   :  { %v351_v63 = vadd.f32 1.0, %v1106_v62 }
 0x646   :  { %1107 = vrcp.f32 %v351_v63 }
 0x653   :  { %v1108_v3 = vpop.eup %1107 }
 0x654   :  { %v355_v8 = vmul.f32 %v1108_v3, %v256_v48 }
 0x6b4   :  { %v358_v4 = vpop.permute.xlu0 %357 }
 0x6b5   :  { %v360_v6 = vmul.f32 %v1108_v3, %v358_v4 }
 0x6b7   :  { %362 = vrot.lane.b32.xlu1 %v360_v6, %s1154_s7 }
 0x729   :  { %v363_v10 = vpop.permute.xlu1 %362 }
 0x72a   :  { %v365_v11 = vadd.f32 %v363_v10, %v355_v8 }
 0x72c   :  { %1109 = vtanh.f32 %v365_v11 }
 0x739   :  { %v1110_v13 = vpop.eup %1109 }
 0x73a   :  { %368 = vrot.lane.b32.xlu0 %v1110_v13, %s1155_s13 }
 0x73e   :  { %376 = vperm.xlu0 %1085, %v937_v14  }
 0x7ac   :  { %v369_v15 = vpop.permute.xlu0 %368 }
 0x7ad   :  { %v371_v16 = vmul.f32 %v369_v15, %v347_v59  ;;  %v946_v15 = vld [vmem:[%s1392_s0 + $0x18] sm:$0xf] }
 0x7af   :  { %381 = vrot.lane.b32.xlu1 %v371_v16, %s1154_s7 }
 0x7b9   :  { %v377_v18 = vpop.permute.xlu0 %376 }
 0x7ba   :  { %v379_v19 = vmul.f32 %v1257_v9, %v377_v18 }
 0x821   :  { %v382_v17 = vpop.permute.xlu1 %381 }
 0x822   :  { %1034 = vmatmul.mubr.msk.f32.vlgmr.msra.gmra.mxu1 %vm44_vm1, %v382_v17 }
 0x823   :  { %1048 = vmatpush3.msra.mxu1 %v1195_v1  ;;  %1055 = vmatprep.mubr.msk.f32.mxu1 %vm1152_vm0, %v1151_v0 }
 0x824   :  { %1049 = vmatprep.subr.mxu1 %v1151_v0 }
 0x825   :  { %1050 = vmatpush3.msra.mxu1 %v1200_v2 }
 0x826   :  { %1051 = vmatprep.subr.mxu1 %v1151_v0 }
 0x827   :  { %1052 = vmatpush3.msra.mxu1 %v1212_v5 }
 0x828   :  { %1053 = vmatprep.subr.mxu1 %v1151_v0 }
 0x829   :  { %1054 = vmatpush3.msra.mxu1 %v1223_v7 }
 0x82a   :  { %1069 = vmatprep.subr.mxu1 %v1151_v0 }
 0x8e2   :  { %v451_v20 = vpop.f32.mrf.mxu1 }
 0x8e3   :  { %v455_v21 = vadd.f32 %v451_v20, %v379_v19 }
 0x8e4   :  { %v1035_v22 = vpop.f32.mrf.mxu1 }
 0x8e5   :  { %v456_v23 = vadd.f32 %v1263_v12, %v455_v21 }
 0x8e7   :  { %1111 = vtanh.f32 %v456_v23  ;;  %v939_v25 = vmul.f32 -1.442695, %v456_v23 }
 0x8e9   :  { %1113 = vpow2.f32 %v939_v25 }
 0x8f4   :  { %v1112_v24 = vpop.eup %1111 }
 0x8f5   :  { %466 = vrot.lane.b32.xlu1 %v1112_v24, %s1155_s13 }
 0x8f6   :  { %v1114_v26 = vpop.eup %1113 }
 0x8f7   :  { %v460_v27 = vadd.f32 1.0, %v1114_v26 }
 0x8f9   :  { %1115 = vrcp.f32 %v460_v27 }
 0x906   :  { %v1116_v28 = vpop.eup %1115 }
 0x907   :  { %v464_v31 = vmul.f32 %v1116_v28, %v365_v11 }
 0x967   :  { %v467_v29 = vpop.permute.xlu1 %466 }
 0x968   :  { %v469_v30 = vmul.f32 %v1116_v28, %v467_v29 }
 0x96a   :  { %471 = vrot.lane.b32.xlu0 %v469_v30, %s1154_s7 }
 0x9dc   :  { %v472_v32 = vpop.permute.xlu0 %471 }
 0x9dd   :  { %v474_v33 = vadd.f32 %v472_v32, %v464_v31 }
 0x9df   :  { %1117 = vtanh.f32 %v474_v33 }
 0x9ec   :  { %v1118_v34 = vpop.eup %1117 }
 0x9ed   :  { %477 = vrot.lane.b32.xlu1 %v1118_v34, %s1155_s13 }
 0x9f1   :  { %485 = vperm.xlu1 %1086, %v940_v35  }
 0xa5f   :  { %v478_v36 = vpop.permute.xlu1 %477 }
 0xa60   :  { %v480_v37 = vmul.f32 %v478_v36, %v456_v23  ;;  %v949_v36 = vld [vmem:[%s1392_s0 + $0x1c] sm:$0xf] }
 0xa62   :  { %490 = vrot.lane.b32.xlu0 %v480_v37, %s1154_s7 }
 0xa6c   :  { %v486_v39 = vpop.permute.xlu1 %485 }
 0xa6d   :  { %v488_v40 = vmul.f32 %v1257_v9, %v486_v39 }
 0xad4   :  { %v491_v38 = vpop.permute.xlu0 %490 }
 0xad5   :  { %1045 = vmatmul.mubr.msk.f32.vlgmr.msra.gmra.mxu0 %vm44_vm1, %v491_v38 }
 0xad6   :  { %1059 = vmatpush3.msra.mxu0 %v1195_v1  ;;  %1066 = vmatprep.mubr.msk.f32.mxu0 %vm1152_vm0, %v1151_v0 }
 0xad7   :  { %1060 = vmatprep.subr.mxu0 %v1151_v0 }
 0xad8   :  { %1061 = vmatpush3.msra.mxu0 %v1200_v2 }
 0xad9   :  { %1062 = vmatprep.subr.mxu0 %v1151_v0 }
 0xada   :  { %1063 = vmatpush3.msra.mxu0 %v1212_v5 }
 0xadb   :  { %1064 = vmatprep.subr.mxu0 %v1151_v0 }
 0xadc   :  { %1065 = vmatpush3.msra.mxu0 %v1223_v7 }
 0xb95   :  { %v560_v41 = vpop.f32.mrf.mxu0 }
 0xb96   :  { %v564_v42 = vadd.f32 %v560_v41, %v488_v40 }
 0xb97   :  { %v1046_v43 = vpop.f32.mrf.mxu0 }
 0xb98   :  { %v565_v44 = vadd.f32 %v1263_v12, %v564_v42 }
 0xb9a   :  { %1119 = vtanh.f32 %v565_v44  ;;  %v942_v46 = vmul.f32 -1.442695, %v565_v44 }
 0xb9c   :  { %1121 = vpow2.f32 %v942_v46 }
 0xba7   :  { %v1120_v45 = vpop.eup %1119 }
 0xba8   :  { %575 = vrot.lane.b32.xlu0 %v1120_v45, %s1155_s13 }
 0xba9   :  { %v1122_v47 = vpop.eup %1121 }
 0xbaa   :  { %v569_v48 = vadd.f32 1.0, %v1122_v47 }
 0xbac   :  { %1123 = vrcp.f32 %v569_v48 }
 0xbb9   :  { %v1124_v49 = vpop.eup %1123 }
 0xbba   :  { %v573_v52 = vmul.f32 %v1124_v49, %v474_v33 }
 0xc1a   :  { %v576_v50 = vpop.permute.xlu0 %575 }
 0xc1b   :  { %v578_v51 = vmul.f32 %v1124_v49, %v576_v50 }
 0xc1d   :  { %580 = vrot.lane.b32.xlu1 %v578_v51, %s1154_s7 }
 0xc8f   :  { %v581_v53 = vpop.permute.xlu1 %580 }
 0xc90   :  { %v583_v54 = vadd.f32 %v581_v53, %v573_v52 }
 0xc92   :  { %1125 = vtanh.f32 %v583_v54 }
 0xc9f   :  { %v1126_v55 = vpop.eup %1125 }
 0xca0   :  { %586 = vrot.lane.b32.xlu0 %v1126_v55, %s1155_s13 }
 0xca4   :  { %594 = vperm.xlu0 %1085, %v943_v56  }
 0xd12   :  { %v587_v57 = vpop.permute.xlu0 %586 }
 0xd13   :  { %v589_v58 = vmul.f32 %v587_v57, %v565_v44 }
 0xd15   :  { %599 = vrot.lane.b32.xlu1 %v589_v58, %s1154_s7 }
 0xd1f   :  { %v595_v60 = vpop.permute.xlu0 %594 }
 0xd20   :  { %v597_v61 = vmul.f32 %v1257_v9, %v595_v60 }
 0xd87   :  { %v600_v59 = vpop.permute.xlu1 %599 }
 0xd88   :  { %1056 = vmatmul.mubr.msk.f32.vlgmr.msra.gmra.mxu1 %vm44_vm1, %v600_v59 }
 0xd89   :  { %1070 = vmatpush3.msra.mxu1 %v1195_v1  ;;  %1077 = vmatprep.mubr.msk.f32.mxu1 %vm1152_vm0, %v1151_v0 }
 0xd8a   :  { %1071 = vmatprep.subr.mxu1 %v1151_v0 }
 0xd8b   :  { %1072 = vmatpush3.msra.mxu1 %v1200_v2 }
 0xd8c   :  { %1073 = vmatprep.subr.mxu1 %v1151_v0 }
 0xd8d   :  { %1074 = vmatpush3.msra.mxu1 %v1212_v5 }
 0xd8e   :  { %1075 = vmatprep.subr.mxu1 %v1151_v0 }
 0xd8f   :  { %1076 = vmatpush3.msra.mxu1 %v1223_v7 }
 0xe48   :  { %v669_v62 = vpop.f32.mrf.mxu1 }
 0xe49   :  { %v673_v1 = vadd.f32 %v669_v62, %v597_v61 }
 0xe4a   :  { %v1057_v63 = vpop.f32.mrf.mxu1 }
 0xe4b   :  { %v674_v3 = vadd.f32 %v1263_v12, %v673_v1 }
 0xe4d   :  { %1127 = vtanh.f32 %v674_v3  ;;  %v945_v2 = vmul.f32 -1.442695, %v674_v3 }
 0xe4f   :  { %1129 = vpow2.f32 %v945_v2 }
 0xe5a   :  { %v1128_v4 = vpop.eup %1127 }
 0xe5b   :  { %684 = vrot.lane.b32.xlu1 %v1128_v4, %s1155_s13 }
 0xe5c   :  { %v1130_v6 = vpop.eup %1129 }
 0xe5d   :  { %v678_v5 = vadd.f32 1.0, %v1130_v6 }
 0xe5f   :  { %1131 = vrcp.f32 %v678_v5 }
 0xe6c   :  { %v1132_v0 = vpop.eup %1131 }
 0xe6d   :  { %v682_v10 = vmul.f32 %v1132_v0, %v583_v54 }
 0xecd   :  { %v685_v8 = vpop.permute.xlu1 %684 }
 0xece   :  { %v687_v7 = vmul.f32 %v1132_v0, %v685_v8 }
 0xed0   :  { %689 = vrot.lane.b32.xlu0 %v687_v7, %s1154_s7 }
 0xf42   :  { %v690_v11 = vpop.permute.xlu0 %689 }
 0xf43   :  { %v692_v13 = vadd.f32 %v690_v11, %v682_v10 }
 0xf45   :  { %1133 = vtanh.f32 %v692_v13 }
 0xf52   :  { %v1134_v14 = vpop.eup %1133 }
 0xf53   :  { %695 = vrot.lane.b32.xlu1 %v1134_v14, %s1155_s13 }
 0xf57   :  { %703 = vperm.xlu1 %1086, %v946_v15  }
 0xfc5   :  { %v696_v16 = vpop.permute.xlu1 %695 }
 0xfc6   :  { %v698_v17 = vmul.f32 %v696_v16, %v674_v3 }
 0xfc8   :  { %708 = vrot.lane.b32.xlu0 %v698_v17, %s1154_s7 }
 0xfd2   :  { %v704_v19 = vpop.permute.xlu1 %703 }
 0xfd3   :  { %v706_v20 = vmul.f32 %v1257_v9, %v704_v19 }
0x103a   :  { %v709_v18 = vpop.permute.xlu0 %708 }
0x103b   :  { %1067 = vmatmul.mubr.msk.f32.vlgmr.msra.gmra.mxu0 %vm44_vm1, %v709_v18 }
0x10fb   :  { %v778_v21 = vpop.f32.mrf.mxu0 }
0x10fc   :  { %v782_v22 = vadd.f32 %v778_v21, %v706_v20 }
0x10fd   :  { %v1068_v23 = vpop.f32.mrf.mxu0 }
0x10fe   :  { %v783_v24 = vadd.f32 %v1263_v12, %v782_v22 }
0x1100   :  { %1135 = vtanh.f32 %v783_v24  ;;  %v948_v26 = vmul.f32 -1.442695, %v783_v24 }
0x1102   :  { %1137 = vpow2.f32 %v948_v26 }
0x110d   :  { %v1136_v25 = vpop.eup %1135 }
0x110e   :  { %793 = vrot.lane.b32.xlu0 %v1136_v25, %s1155_s13 }
0x110f   :  { %v1138_v27 = vpop.eup %1137 }
0x1110   :  { %v787_v28 = vadd.f32 1.0, %v1138_v27 }
0x1112   :  { %1139 = vrcp.f32 %v787_v28 }
0x111f   :  { %v1140_v29 = vpop.eup %1139 }
0x1120   :  { %v791_v32 = vmul.f32 %v1140_v29, %v692_v13 }
0x1180   :  { %v794_v30 = vpop.permute.xlu0 %793 }
0x1181   :  { %v796_v31 = vmul.f32 %v1140_v29, %v794_v30 }
0x1183   :  { %798 = vrot.lane.b32.xlu1 %v796_v31, %s1154_s7 }
0x11f5   :  { %v799_v33 = vpop.permute.xlu1 %798 }
0x11f6   :  { %v801_v34 = vadd.f32 %v799_v33, %v791_v32 }
0x11f8   :  { %1141 = vtanh.f32 %v801_v34 }
0x1205   :  { %v1142_v35 = vpop.eup %1141 }
0x1206   :  { %804 = vrot.lane.b32.xlu0 %v1142_v35, %s1155_s13 }
0x120a   :  { %812 = vperm.xlu0 %1085, %v949_v36  }
0x1278   :  { %v805_v37 = vpop.permute.xlu0 %804 }
0x1279   :  { %v807_v38 = vmul.f32 %v805_v37, %v783_v24 }
0x127b   :  { %817 = vrot.lane.b32.xlu1 %v807_v38, %s1154_s7 }
0x1285   :  { %v813_v40 = vpop.permute.xlu0 %812 }
0x1286   :  { %v815_v41 = vmul.f32 %v1257_v9, %v813_v40 }
0x12ed   :  { %v818_v39 = vpop.permute.xlu1 %817 }
0x12ee   :  { %1078 = vmatmul.mubr.msk.f32.vlgmr.msra.gmra.mxu1 %vm44_vm1, %v818_v39 }
0x13ae   :  { %v887_v42 = vpop.f32.mrf.mxu1 }
0x13af   :  { %v891_v43 = vadd.f32 %v887_v42, %v815_v41 }
0x13b0   :  { %v1079_v44 = vpop.f32.mrf.mxu1 }
0x13b1   :  { %v892_v45 = vadd.f32 %v1263_v12, %v891_v43 }
0x13b3   :  { %1143 = vtanh.f32 %v892_v45  ;;  %v951_v47 = vmul.f32 -1.442695, %v892_v45 }
0x13b5   :  { %1145 = vpow2.f32 %v951_v47 }
0x13c0   :  { %v1144_v46 = vpop.eup %1143 }
0x13c1   :  { %902 = vrot.lane.b32.xlu1 %v1144_v46, %s1155_s13 }
0x13c2   :  { %v1146_v48 = vpop.eup %1145 }
0x13c3   :  { %v896_v49 = vadd.f32 1.0, %v1146_v48 }
0x13c5   :  { %1147 = vrcp.f32 %v896_v49 }
0x13d2   :  { %v1148_v50 = vpop.eup %1147 }
0x13d3   :  { %v900_v9 = vmul.f32 %v1148_v50, %v801_v34 }
0x1433   :  { %v903_v51 = vpop.permute.xlu1 %902 }
0x1434   :  { %v905_v52 = vmul.f32 %v1148_v50, %v903_v51 }
0x1436   :  { %907 = vrot.lane.b32.xlu0 %v905_v52, %s1154_s7 }
0x14a8   :  { %v908_v53 = vpop.permute.xlu0 %907 }
0x14a9   :  { %v910_v54 = vadd.f32 %v908_v53, %v900_v9 }
0x14ab   :  { %1149 = vtanh.f32 %v910_v54 }
0x14b8   :  { %v1150_v55 = vpop.eup %1149 }
0x14b9   :  { %913 = vrot.lane.b32.xlu1 %v1150_v55, %s1155_s13 }
0x152b   :  { %v914_v12 = vpop.permute.xlu1 %913 }
0x152c   :  { %v916_v56 = vmul.f32 %v914_v12, %v892_v45 }
0x152e   :  { %918 = vrot.lane.b32.xlu0 %v916_v56, %s1154_s7 }
0x15a0   :  { %v919_v57 = vpop.permute.xlu0 %918 }
0x15a1   :  { %922 = vst.msk [vmem:[%s1397_s6] sm:$0xf] %vm921_vm2, %v919_v57 }

</bundles_post_ra>
